<compile_context>
chip_gen: v6e
topology: v6e:2x2x1
jax: 0.10.0
libtpu: 0.0.40
codegen_flags: <defaults>
</compile_context>

<pallas_src>
import functools
from collections import defaultdict

import numpy as np
import jax
import jax.numpy as jnp
from jax.experimental import pallas as pl
from jax.experimental.pallas import tpu as pltpu


# ----------------------------------------------------------------------------
# Fused kernel: one grid step = (batch element n, pixel tile h, ensemble member e)
# ----------------------------------------------------------------------------
def _ensemble_kernel(x_ref, w1t_ref, b1_ref, w2t_ref, b2_ref,
                     feat_ref, logit_ref, *, inv_hw, inv_e):
    # x_ref   : (C_in,  hw_tile)    channel-major pixel tile of batch element n
    # w1t_ref : (C_feat, C_in)      member-e pointwise-conv weight (transposed)
    # b1_ref  : (C_feat, 1)
    # w2t_ref : (n_cls,  C_feat)    member-e classifier weight (transposed)
    # b2_ref  : (n_cls,  1)
    # feat_ref: (C_feat, hw_tile)   accumulator: mean over E (revisited across e)
    # logit_ref:(n_cls,  1)         accumulator: mean over E (revisited across h and e)
    h = pl.program_id(1)
    e = pl.program_id(2)
    nh = pl.num_programs(1)
    ne = pl.num_programs(2)

    # pointwise conv in channel-major layout -> lane-dense (C_feat, hw_tile) tile
    featT = jnp.dot(w1t_ref[...], x_ref[...],
                    preferred_element_type=jnp.float32) + b1_ref[...]

    # ---- features: mean over ensemble members, accumulated in the output block
    @pl.when(e == 0)
    def _():
        feat_ref[...] = featT

    @pl.when(e != 0)
    def _():
        feat_ref[...] += featT

    @pl.when(e == ne - 1)
    def _():
        feat_ref[...] = feat_ref[...] * inv_e

    # ---- logits: GAP + linear head.  By linearity GAP(feat) @ W2 == GAP(W2t @ feat),
    # so we do a well-shaped MXU matmul then a lane reduction (partial per hw tile).
    logit_pix = jnp.dot(w2t_ref[...], featT,
                        preferred_element_type=jnp.float32)        # (n_cls, hw_tile)
    contrib = jnp.sum(logit_pix, axis=1, keepdims=True) * inv_hw   # (n_cls, 1)

    @pl.when(jnp.logical_and(h == 0, e == 0))
    def _():
        logit_ref[...] = jnp.zeros_like(logit_ref)

    logit_ref[...] += contrib

    @pl.when(h == 0)                      # member-e bias added exactly once per e
    def _():
        logit_ref[...] += b2_ref[...]

    @pl.when(jnp.logical_and(h == nh - 1, e == ne - 1))
    def _():
        logit_ref[...] = logit_ref[...] * inv_e


def _run_ensemble(x, w1t, b1c, w2t, b2c, *, hw_tile):
    # x: (N, C_in, HW) channel-major; weights stacked along the ensemble axis E.
    N, C_in, HW = x.shape
    E, C_feat, _ = w1t.shape
    n_cls = w2t.shape[1]
    assert HW % hw_tile == 0, "hw_tile must divide H*W"
    nh = HW // hw_tile

    kernel = functools.partial(_ensemble_kernel,
                               inv_hw=1.0 / float(HW),
                               inv_e=1.0 / float(E))

    feat_mean, logit_mean = pl.pallas_call(
        kernel,
        out_shape=(jax.ShapeDtypeStruct((N, C_feat, HW), jnp.float32),
                   jax.ShapeDtypeStruct((N, n_cls, 1), jnp.float32)),
        grid=(N, nh, E),
        in_specs=[
            pl.BlockSpec((None, C_in, hw_tile),  lambda n, h, e: (n, 0, h)),
            pl.BlockSpec((None, C_feat, C_in),   lambda n, h, e: (e, 0, 0)),
            pl.BlockSpec((None, C_feat, 1),      lambda n, h, e: (e, 0, 0)),
            pl.BlockSpec((None, n_cls, C_feat),  lambda n, h, e: (e, 0, 0)),
            pl.BlockSpec((None, n_cls, 1),       lambda n, h, e: (e, 0, 0)),
        ],
        out_specs=(
            pl.BlockSpec((None, C_feat, hw_tile), lambda n, h, e: (n, 0, h)),
            pl.BlockSpec((None, n_cls, 1),        lambda n, h, e: (n, 0, 0)),
        ),
        compiler_params=pltpu.CompilerParams(
            dimension_semantics=("parallel", "arbitrary", "arbitrary")),
    )(x, w1t, b1c, w2t, b2c)
    return feat_mean, logit_mean


def _pick_hw_tile(hw, c_feat, budget_bytes=2 << 20):
    # Largest multiple of 128 that divides HW and keeps the feature tile small.
    # TODO(synk): re-derive the byte budget per generation (v7x has 64 MiB VMEM).
    if hw % 128 != 0:
        return hw
    max_rows = max(128, ((budget_bytes // (4 * max(c_feat, 1))) // 128) * 128)
    t = min(hw, max_rows)
    while hw % t != 0:
        t -= 128
    return t


# ----------------------------------------------------------------------------
# Ensemble forward: NCHW in / NCHW out, mean over E member models per output key
# ----------------------------------------------------------------------------
def ensemble_forward(x_nchw, w1, b1, w2, b2, *, hw_tile=None):
    # w1: (E, C_in, C_feat)   b1: (E, C_feat)   w2: (E, C_feat, n_cls)   b2: (E, n_cls)
    N, C_in, H, W = x_nchw.shape
    E, _, C_feat = w1.shape
    n_cls = w2.shape[-1]
    HW = H * W

    x = x_nchw.reshape(N, C_in, HW)                     # channel-major, no transpose
    w1t = jnp.transpose(w1, (0, 2, 1))                  # (E, C_feat, C_in)
    b1c = b1.reshape(E, C_feat, 1)
    w2t = jnp.transpose(w2, (0, 2, 1))                  # (E, n_cls, C_feat)
    b2c = b2.reshape(E, n_cls, 1)

    if hw_tile is None:
        hw_tile = _pick_hw_tile(HW, C_feat)

    feat_mean, logit_mean = _run_ensemble(x, w1t, b1c, w2t, b2c, hw_tile=hw_tile)

    features = feat_mean.reshape(N, C_feat, H, W)       # already NCHW
    logits = logit_mean[..., 0]                         # (N, n_cls)
    return {"features": features, "logits": logits}


# ----------------------------------------------------------------------------
if __name__ == "__main__":
    key = jax.random.PRNGKey(0)
    kx, k1, kb1, k2, kb2 = jax.random.split(key, 5)

    N, C_in, H, W = 2, 4, 16, 16
    C_feat, n_cls, E = 32, 8, 3          # ensemble of 3 member models

    x = jax.random.normal(kx, (N, C_in, H, W), dtype=jnp.float32)
    w1 = 0.1 * jax.random.normal(k1, (E, C_in, C_feat), dtype=jnp.float32)
    b1 = 0.1 * jax.random.normal(kb1, (E, C_feat), dtype=jnp.float32)
    w2 = 0.1 * jax.random.normal(k2, (E, C_feat, n_cls), dtype=jnp.float32)
    b2 = 0.1 * jax.random.normal(kb2, (E, n_cls), dtype=jnp.float32)

    # hw_tile=128 with HW=256 exercises the multi-tile (partial-GAP) accumulation path
    out = ensemble_forward(x, w1, b1, w2, b2, hw_tile=128)
    jax.block_until_ready(out)

    # -------- pure-JAX reference mirroring Ensemble.forward (NCHW) --------
    def model_ref(xin, e):
        feat = jnp.einsum('nchw,cf->nfhw', xin, w1[e]) + b1[e][None, :, None, None]
        pooled = jnp.mean(feat, axis=(2, 3))
        logits = pooled @ w2[e] + b2[e]
        return {"features": feat, "logits": logits}

    acc = defaultdict(list)
    for e in range(E):
        od = model_ref(x, e)
        for k, v in od.items():
            acc[k].append(v)
    ref = {k: jnp.mean(jnp.stack(v), axis=0) for k, v in acc.items()}

    assert np.allclose(np.asarray(out["features"]), np.asarray(ref["features"]),
                       atol=1e-4, rtol=1e-4)
    assert np.allclose(np.asarray(out["logits"]), np.asarray(ref["logits"]),
                       atol=1e-4, rtol=1e-4)

    print("KERNEL_OK")
</pallas_src>

<mosaic_0001>
module attributes {stable_mosaic.version = 11 : i64} {
  func.func @_ensemble_kernel(%arg0: i32, %arg1: i32, %arg2: i32, %arg3: memref<1x4x128xf32, #tpu.memory_space<vmem>>, %arg4: memref<1x32x4xf32, #tpu.memory_space<vmem>>, %arg5: memref<1x32x1xf32, #tpu.memory_space<vmem>>, %arg6: memref<1x8x32xf32, #tpu.memory_space<vmem>>, %arg7: memref<1x8x1xf32, #tpu.memory_space<vmem>>, %arg8: memref<1x32x128xf32, #tpu.memory_space<vmem>>, %arg9: memref<1x8x1xf32, #tpu.memory_space<vmem>>) attributes {dimension_semantics = [#tpu.dimension_semantics<parallel>, #tpu.dimension_semantics<arbitrary>, #tpu.dimension_semantics<arbitrary>], iteration_bounds = array<i64: 2, 2, 3>, scalar_prefetch = 0 : i64, scratch_operands = 0 : i64, tpu.core_type = #tpu.core_type<tc>, window_params = [{transform_indices = @transform_0, window_bounds = array<i64: 1, 4, 128>}, {transform_indices = @transform_1, window_bounds = array<i64: 1, 32, 4>}, {transform_indices = @transform_2, window_bounds = array<i64: 1, 32, 1>}, {transform_indices = @transform_3, window_bounds = array<i64: 1, 8, 32>}, {transform_indices = @transform_4, window_bounds = array<i64: 1, 8, 1>}, {transform_indices = @transform_5, window_bounds = array<i64: 1, 32, 128>}, {transform_indices = @transform_6, window_bounds = array<i64: 1, 8, 1>}]} {
    %c0 = arith.constant 0 : index
    %c0_0 = arith.constant 0 : index
    %c0_1 = arith.constant 0 : index
    %0 = vector.load %arg4[%c0, %c0_0, %c0_1] : memref<1x32x4xf32, #tpu.memory_space<vmem>>, vector<1x32x4xf32>
    %1 = vector.shape_cast %0 : vector<1x32x4xf32> to vector<32x4xf32>
    %c0_2 = arith.constant 0 : index
    %c0_3 = arith.constant 0 : index
    %c0_4 = arith.constant 0 : index
    %2 = vector.load %arg3[%c0_2, %c0_3, %c0_4] : memref<1x4x128xf32, #tpu.memory_space<vmem>>, vector<1x4x128xf32>
    %3 = vector.shape_cast %2 : vector<1x4x128xf32> to vector<4x128xf32>
    %cst = arith.constant dense<0.000000e+00> : vector<32x128xf32>
    %4 = tpu.matmul %1, %3, %cst {dimension_numbers = #tpu.dot_dimension_numbers<[1], [0], [0], [1], [0, 0, 1, 1], [], []>} : vector<32x4xf32>, vector<4x128xf32>, vector<32x128xf32> -> vector<32x128xf32>
    %c0_5 = arith.constant 0 : index
    %c0_6 = arith.constant 0 : index
    %c0_7 = arith.constant 0 : index
    %5 = vector.load %arg5[%c0_5, %c0_6, %c0_7] : memref<1x32x1xf32, #tpu.memory_space<vmem>>, vector<1x32x1xf32>
    %6 = vector.shape_cast %5 : vector<1x32x1xf32> to vector<32x1xf32>
    %7 = vector.broadcast %6 : vector<32x1xf32> to vector<32x128xf32>
    %8 = arith.addf %4, %7 : vector<32x128xf32>
    %c0_i32 = arith.constant 0 : i32
    %9 = arith.cmpi eq, %arg2, %c0_i32 : i32
    %10 = arith.extui %9 : i1 to i32
    %c0_i32_8 = arith.constant 0 : i32
    %11 = arith.cmpi ne, %10, %c0_i32_8 : i32
    scf.if %11 {
      %c0_31 = arith.constant 0 : index
      %c0_32 = arith.constant 0 : index
      %c0_33 = arith.constant 0 : index
      %44 = vector.load %arg8[%c0_31, %c0_32, %c0_33] : memref<1x32x128xf32, #tpu.memory_space<vmem>>, vector<1x32x128xf32>
      %45 = vector.shape_cast %44 : vector<1x32x128xf32> to vector<32x128xf32>
      %46 = vector.shape_cast %8 : vector<32x128xf32> to vector<1x32x128xf32>
      tpu.vector_store %arg8[%c0_31, %c0_32, %c0_33], %46 {strides = array<i32>} : memref<1x32x128xf32, #tpu.memory_space<vmem>>, vector<1x32x128xf32>,
    } else {
    }
    %c0_i32_9 = arith.constant 0 : i32
    %12 = arith.cmpi ne, %arg2, %c0_i32_9 : i32
    %13 = arith.extui %12 : i1 to i32
    %c0_i32_10 = arith.constant 0 : i32
    %14 = arith.cmpi ne, %13, %c0_i32_10 : i32
    scf.if %14 {
      %c0_31 = arith.constant 0 : index
      %c0_32 = arith.constant 0 : index
      %c0_33 = arith.constant 0 : index
      %44 = vector.load %arg8[%c0_31, %c0_32, %c0_33] : memref<1x32x128xf32, #tpu.memory_space<vmem>>, vector<1x32x128xf32>
      %45 = vector.shape_cast %44 : vector<1x32x128xf32> to vector<32x128xf32>
      %46 = arith.addf %45, %8 : vector<32x128xf32>
      %c0_34 = arith.constant 0 : index
      %c0_35 = arith.constant 0 : index
      %c0_36 = arith.constant 0 : index
      %47 = vector.load %arg8[%c0_34, %c0_35, %c0_36] : memref<1x32x128xf32, #tpu.memory_space<vmem>>, vector<1x32x128xf32>
      %48 = vector.shape_cast %47 : vector<1x32x128xf32> to vector<32x128xf32>
      %49 = vector.shape_cast %46 : vector<32x128xf32> to vector<1x32x128xf32>
      tpu.vector_store %arg8[%c0_34, %c0_35, %c0_36], %49 {strides = array<i32>} : memref<1x32x128xf32, #tpu.memory_space<vmem>>, vector<1x32x128xf32>,
    } else {
    }
    %c2_i32 = arith.constant 2 : i32
    %15 = arith.cmpi eq, %arg2, %c2_i32 : i32
    %16 = arith.extui %15 : i1 to i32
    %c0_i32_11 = arith.constant 0 : i32
    %17 = arith.cmpi ne, %16, %c0_i32_11 : i32
    scf.if %17 {
      %c0_31 = arith.constant 0 : index
      %c0_32 = arith.constant 0 : index
      %c0_33 = arith.constant 0 : index
      %44 = vector.load %arg8[%c0_31, %c0_32, %c0_33] : memref<1x32x128xf32, #tpu.memory_space<vmem>>, vector<1x32x128xf32>
      %45 = vector.shape_cast %44 : vector<1x32x128xf32> to vector<32x128xf32>
      %cst_34 = arith.constant 0.333333343 : f32
      %46 = vector.broadcast %cst_34 : f32 to vector<32x128xf32>
      %47 = arith.mulf %45, %46 : vector<32x128xf32>
      %c0_35 = arith.constant 0 : index
      %c0_36 = arith.constant 0 : index
      %c0_37 = arith.constant 0 : index
      %48 = vector.load %arg8[%c0_35, %c0_36, %c0_37] : memref<1x32x128xf32, #tpu.memory_space<vmem>>, vector<1x32x128xf32>
      %49 = vector.shape_cast %48 : vector<1x32x128xf32> to vector<32x128xf32>
      %50 = vector.shape_cast %47 : vector<32x128xf32> to vector<1x32x128xf32>
      tpu.vector_store %arg8[%c0_35, %c0_36, %c0_37], %50 {strides = array<i32>} : memref<1x32x128xf32, #tpu.memory_space<vmem>>, vector<1x32x128xf32>,
    } else {
    }
    %c0_12 = arith.constant 0 : index
    %c0_13 = arith.constant 0 : index
    %c0_14 = arith.constant 0 : index
    %18 = vector.load %arg6[%c0_12, %c0_13, %c0_14] : memref<1x8x32xf32, #tpu.memory_space<vmem>>, vector<1x8x32xf32>
    %19 = vector.shape_cast %18 : vector<1x8x32xf32> to vector<8x32xf32>
    %cst_15 = arith.constant dense<0.000000e+00> : vector<8x128xf32>
    %20 = tpu.matmul %19, %8, %cst_15 {dimension_numbers = #tpu.dot_dimension_numbers<[1], [0], [0], [1], [0, 0, 1, 1], [], []>} : vector<8x32xf32>, vector<32x128xf32>, vector<8x128xf32> -> vector<8x128xf32>
    %cst_16 = arith.constant dense<0.000000e+00> : vector<8xf32>
    %21 = vector.multi_reduction <add>, %20, %cst_16 [1] : vector<8x128xf32> to vector<8xf32>
    %22 = vector.shape_cast %21 : vector<8xf32> to vector<8x1xf32>
    %cst_17 = arith.constant 3.906250e-03 : f32
    %23 = vector.broadcast %cst_17 : f32 to vector<8x1xf32>
    %24 = arith.mulf %22, %23 : vector<8x1xf32>
    %c0_i32_18 = arith.constant 0 : i32
    %25 = arith.cmpi eq, %arg1, %c0_i32_18 : i32
    %c0_i32_19 = arith.constant 0 : i32
    %26 = arith.cmpi eq, %arg2, %c0_i32_19 : i32
    %27 = arith.andi %25, %26 : i1
    %28 = arith.extui %27 : i1 to i32
    %c0_i32_20 = arith.constant 0 : i32
    %29 = arith.cmpi ne, %28, %c0_i32_20 : i32
    scf.if %29 {
      %cst_31 = arith.constant 0.000000e+00 : f32
      %44 = vector.broadcast %cst_31 : f32 to vector<8x1xf32>
      %c0_32 = arith.constant 0 : index
      %c0_33 = arith.constant 0 : index
      %c0_34 = arith.constant 0 : index
      %45 = vector.load %arg9[%c0_32, %c0_33, %c0_34] : memref<1x8x1xf32, #tpu.memory_space<vmem>>, vector<1x8x1xf32>
      %46 = vector.shape_cast %45 : vector<1x8x1xf32> to vector<8x1xf32>
      %47 = vector.shape_cast %44 : vector<8x1xf32> to vector<1x8x1xf32>
      tpu.vector_store %arg9[%c0_32, %c0_33, %c0_34], %47 {strides = array<i32>} : memref<1x8x1xf32, #tpu.memory_space<vmem>>, vector<1x8x1xf32>,
    } else {
    }
    %c0_21 = arith.constant 0 : index
    %c0_22 = arith.constant 0 : index
    %c0_23 = arith.constant 0 : index
    %30 = vector.load %arg9[%c0_21, %c0_22, %c0_23] : memref<1x8x1xf32, #tpu.memory_space<vmem>>, vector<1x8x1xf32>
    %31 = vector.shape_cast %30 : vector<1x8x1xf32> to vector<8x1xf32>
    %32 = arith.addf %31, %24 : vector<8x1xf32>
    %c0_24 = arith.constant 0 : index
    %c0_25 = arith.constant 0 : index
    %c0_26 = arith.constant 0 : index
    %33 = vector.load %arg9[%c0_24, %c0_25, %c0_26] : memref<1x8x1xf32, #tpu.memory_space<vmem>>, vector<1x8x1xf32>
    %34 = vector.shape_cast %33 : vector<1x8x1xf32> to vector<8x1xf32>
    %35 = vector.shape_cast %32 : vector<8x1xf32> to vector<1x8x1xf32>
    tpu.vector_store %arg9[%c0_24, %c0_25, %c0_26], %35 {strides = array<i32>} : memref<1x8x1xf32, #tpu.memory_space<vmem>>, vector<1x8x1xf32>,
    %c0_i32_27 = arith.constant 0 : i32
    %36 = arith.cmpi eq, %arg1, %c0_i32_27 : i32
    %37 = arith.extui %36 : i1 to i32
    %c0_i32_28 = arith.constant 0 : i32
    %38 = arith.cmpi ne, %37, %c0_i32_28 : i32
    scf.if %38 {
      %c0_31 = arith.constant 0 : index
      %c0_32 = arith.constant 0 : index
      %c0_33 = arith.constant 0 : index
      %44 = vector.load %arg9[%c0_31, %c0_32, %c0_33] : memref<1x8x1xf32, #tpu.memory_space<vmem>>, vector<1x8x1xf32>
      %45 = vector.shape_cast %44 : vector<1x8x1xf32> to vector<8x1xf32>
      %c0_34 = arith.constant 0 : index
      %c0_35 = arith.constant 0 : index
      %c0_36 = arith.constant 0 : index
      %46 = vector.load %arg7[%c0_34, %c0_35, %c0_36] : memref<1x8x1xf32, #tpu.memory_space<vmem>>, vector<1x8x1xf32>
      %47 = vector.shape_cast %46 : vector<1x8x1xf32> to vector<8x1xf32>
      %48 = arith.addf %45, %47 : vector<8x1xf32>
      %c0_37 = arith.constant 0 : index
      %c0_38 = arith.constant 0 : index
      %c0_39 = arith.constant 0 : index
      %49 = vector.load %arg9[%c0_37, %c0_38, %c0_39] : memref<1x8x1xf32, #tpu.memory_space<vmem>>, vector<1x8x1xf32>
      %50 = vector.shape_cast %49 : vector<1x8x1xf32> to vector<8x1xf32>
      %51 = vector.shape_cast %48 : vector<8x1xf32> to vector<1x8x1xf32>
      tpu.vector_store %arg9[%c0_37, %c0_38, %c0_39], %51 {strides = array<i32>} : memref<1x8x1xf32, #tpu.memory_space<vmem>>, vector<1x8x1xf32>,
    } else {
    }
    %c1_i32 = arith.constant 1 : i32
    %39 = arith.cmpi eq, %arg1, %c1_i32 : i32
    %c2_i32_29 = arith.constant 2 : i32
    %40 = arith.cmpi eq, %arg2, %c2_i32_29 : i32
    %41 = arith.andi %39, %40 : i1
    %42 = arith.extui %41 : i1 to i32
    %c0_i32_30 = arith.constant 0 : i32
    %43 = arith.cmpi ne, %42, %c0_i32_30 : i32
    scf.if %43 {
      %c0_31 = arith.constant 0 : index
      %c0_32 = arith.constant 0 : index
      %c0_33 = arith.constant 0 : index
      %44 = vector.load %arg9[%c0_31, %c0_32, %c0_33] : memref<1x8x1xf32, #tpu.memory_space<vmem>>, vector<1x8x1xf32>
      %45 = vector.shape_cast %44 : vector<1x8x1xf32> to vector<8x1xf32>
      %cst_34 = arith.constant 0.333333343 : f32
      %46 = vector.broadcast %cst_34 : f32 to vector<8x1xf32>
      %47 = arith.mulf %45, %46 : vector<8x1xf32>
      %c0_35 = arith.constant 0 : index
      %c0_36 = arith.constant 0 : index
      %c0_37 = arith.constant 0 : index
      %48 = vector.load %arg9[%c0_35, %c0_36, %c0_37] : memref<1x8x1xf32, #tpu.memory_space<vmem>>, vector<1x8x1xf32>
      %49 = vector.shape_cast %48 : vector<1x8x1xf32> to vector<8x1xf32>
      %50 = vector.shape_cast %47 : vector<8x1xf32> to vector<1x8x1xf32>
      tpu.vector_store %arg9[%c0_35, %c0_36, %c0_37], %50 {strides = array<i32>} : memref<1x8x1xf32, #tpu.memory_space<vmem>>, vector<1x8x1xf32>,
    } else {
    }
    return
  }
  func.func @transform_0(%arg0: i32, %arg1: i32, %arg2: i32) -> (i32, i32, i32) {
    %c0_i32 = arith.constant 0 : i32
    %c0_i32_0 = arith.constant 0 : i32
    return %arg0, %c0_i32, %arg1 : i32, i32, i32
  }
  func.func @transform_1(%arg0: i32, %arg1: i32, %arg2: i32) -> (i32, i32, i32) {
    %c0_i32 = arith.constant 0 : i32
    %c0_i32_0 = arith.constant 0 : i32
    %c0_i32_1 = arith.constant 0 : i32
    return %arg2, %c0_i32, %c0_i32_0 : i32, i32, i32
  }
  func.func @transform_2(%arg0: i32, %arg1: i32, %arg2: i32) -> (i32, i32, i32) {
    %c0_i32 = arith.constant 0 : i32
    %c0_i32_0 = arith.constant 0 : i32
    %c0_i32_1 = arith.constant 0 : i32
    return %arg2, %c0_i32, %c0_i32_0 : i32, i32, i32
  }
  func.func @transform_3(%arg0: i32, %arg1: i32, %arg2: i32) -> (i32, i32, i32) {
    %c0_i32 = arith.constant 0 : i32
    %c0_i32_0 = arith.constant 0 : i32
    %c0_i32_1 = arith.constant 0 : i32
    return %arg2, %c0_i32, %c0_i32_0 : i32, i32, i32
  }
  func.func @transform_4(%arg0: i32, %arg1: i32, %arg2: i32) -> (i32, i32, i32) {
    %c0_i32 = arith.constant 0 : i32
    %c0_i32_0 = arith.constant 0 : i32
    %c0_i32_1 = arith.constant 0 : i32
    return %arg2, %c0_i32, %c0_i32_0 : i32, i32, i32
  }
  func.func @transform_5(%arg0: i32, %arg1: i32, %arg2: i32) -> (i32, i32, i32) {
    %c0_i32 = arith.constant 0 : i32
    %c0_i32_0 = arith.constant 0 : i32
    return %arg0, %c0_i32, %arg1 : i32, i32, i32
  }
  func.func @transform_6(%arg0: i32, %arg1: i32, %arg2: i32) -> (i32, i32, i32) {
    %c0_i32 = arith.constant 0 : i32
    %c0_i32_0 = arith.constant 0 : i32
    %c0_i32_1 = arith.constant 0 : i32
    return %arg0, %c0_i32, %c0_i32_0 : i32, i32, i32
  }
}

</mosaic_0001>

<bundles_post_ra>
// kernel: tpu_custom_call.1
= control target key start
LH: loop header
LB: loop body
LE: loop exit
PB: predicated region body
PF: predicated region fallthrough
CT: control target
= control target key end

     0   :  { %s1371_s0 = inlined_call_operand.vmem [shape: f32[2,4,256], index: 0, kind: input, shape index: {}]   ;;  %s1372_s1 = inlined_call_operand.vmem [shape: f32[3,32,4], index: 1, kind: input, shape index: {}]   ;;  %s1373_s2 = inlined_call_operand.vmem [shape: f32[3,32,1], index: 2, kind: input, shape index: {}]   ;;  %s1374_s3 = inlined_call_operand.vmem [shape: f32[3,8,32], index: 3, kind: input, shape index: {}]   ;;  %s1375_s4 = inlined_call_operand.vmem [shape: f32[3,8,1], index: 4, kind: input, shape index: {}]   ;;  %s1376_s5 = inlined_call_operand.hbm [shape: f32[2,32,256], index: 5, kind: output, shape index: {0}]   ;;  %s1377_s6 = inlined_call_operand.vmem [shape: f32[2,8,1], index: 6, kind: output, shape index: {1}]  }
   0x1   :  { %1385 = sst [smem:[#allocation13_spill]] %s1377_s6 }
   0x2   :  { %12 = vsyncpa [#allocation3], 0 }
   0x3   :  { %14 = vsyncpa [#allocation3 + $0x1], 0  ;;  %s1133_s21 = smov 0   ;;  %s1135_s22 = smov 0  }
   0x4   :  { %s1137_s23 = smov 0   ;;  %s1139_s24 = smov 0  }
   0x5   :  { %s1141_s25 = smov 0   ;;  %s1143_s26 = smov 0  }
   0x6   :  { %s1145_s27 = smov 0   ;;  %s1147_s28 = smov 0  }
   0x7   :  { %s1149_s29 = smov 0   ;;  %s1151_s30 = smov 0  }
   0x8 LB: > { %1386 = sst [smem:[#allocation5_spill]] %s1060_s23  ;;  %s823_s7 = sadd.s32 4294967295, %s1088_s30   ;;  %s1088_s30 = sphi %s1151_s30, %s20_s30   ;;  %s1084_s29 = sphi %s1149_s29, %s1405_s29   ;;  %s1080_s28 = sphi %s1147_s28, %s1404_s28   ;;  %s1076_s27 = sphi %s1145_s27, %s1403_s27   ;;  %s1072_s26 = sphi %s1143_s26, %s1402_s26   ;;  %s1068_s25 = sphi %s1141_s25, %s1401_s25   ;;  %s1064_s24 = sphi %s1139_s24, %s1400_s24   ;;  %s1060_s23 = sphi %s1137_s23, %s1399_s23   ;;  %s1056_s22 = sphi %s1135_s22, %s1407_s22   ;;  %s1052_s21 = sphi %s1133_s21, %s1406_s21  }
   0x9   : > { %1387 = sst [smem:[#allocation6_spill]] %s1076_s27  ;;  %s824_s8 = sadd.s32 4294967294, %s1088_s30  }
   0xa   : > { %1388 = sst [smem:[#allocation7_spill]] %s1080_s28  ;;  %s32_s9 = sadd.s32 1, %s1076_s27 }
   0xb   : > { %1389 = sst [smem:[#allocation8_spill]] %s1084_s29  ;;  %p33_p0 = scmp.ge.s32.totalorder %s32_s9, 3 }
   0xc   : > { %s35_s10 = sadd.s32 1, %s1080_s28  ;;  %s39_s11 = sadd.s32 1, %s1084_s29 }
   0xd   : > { %p190_p1 = scmp.ne.s32.totalorder %s1060_s23, %s1056_s22  ;;  %s1409_s9 = smov (%p33_p0, %s32_s9), 0 }
   0xe   : > { %1390 = sst [smem:[#allocation9_spill]] %s1409_s9  ;;  %s1411_s10 = smov (!%p33_p0, %s35_s10), %s1080_s28 }
   0xf   : > { %p191_p2 = scmp.eq.s32.totalorder %s823_s7, 11  ;;  %p196_p3 = scmp.ne.s32.totalorder %s1056_s22, %s1052_s21 }
  0x10   : > { %p37_p4 = scmp.ge.s32.totalorder %s1411_s10, 2  ;;  %p197_p5 = scmp.eq.s32.totalorder %s824_s8, 11 }
  0x11   : > { %p1195_p6 = por %p191_p2, %p190_p1  ;;  %p827_p8 = scmp.ge.s32.totalorder %s1088_s30, 1 }
  0x12   : > { %s1413_s10 = smov (%p37_p4, %s1411_s10), 0  ;;  %s1415_s11 = smov (!%p37_p4, %s39_s11), %s1084_s29 }
  0x13   : > { %1392 = sst [smem:[#allocation10_spill]] %s1413_s10  ;;  %p1202_p7 = por %p197_p5, %p196_p3 }
  0x14   : > { %p41_p9 = scmp.ge.s32.totalorder %s1415_s11, 2  ;;  %p282_p10 = scmp.lt.s32.totalorder %s1088_s30, 13 }
  0x15   : > { %s176_s14 = ssub.s32 %s1080_s28, %s1413_s10  ;;  %s180_s17 = sadd.s32 1, %s1060_s23 }
  0x16   : > { %s1417_s11 = smov (%p41_p9, %s1415_s11), 0  ;;  %p283_p11 = pnand %p827_p8, %p282_p10 }
  0x17   : > { %1394 = sst [smem:[#allocation11_spill]] %s1417_s11  ;;  %s175_s15 = ssub.s32 %s1084_s29, %s1417_s11 }
  0x18   : > { %s177_s16 = sor.u32 %s176_s14, %s175_s15  ;;  %s1380_s19 = sand.u32 (!%p283_p11), 1, %s1056_s22  }
  0x19   : > { %p178_p12 = scmp.eq.s32.totalorder %s177_s16, 0  ;;  %286 = sbr.rel (%p283_p11) target bundleno = 671 (0x29f), region = 40 }
  0x1a   : > { %p337_p13 = scmp.lt.s32.totalorder (!%p283_p11), %s1072_s26, 1  ;;  %s1222_s20 = sshll.u32 (!%p283_p11), %s1380_s19, 5 }
  0x1b   : > { %s1216_s18 = scalar_select %p178_p12, %s1060_s23, %s180_s17  }
  0x1c   : > { %p339_p0 = scmp.lt.s32.totalorder (!%p283_p11), %s1068_s25, 1  ;;  %p345_p1 = scmp.lt.s32.totalorder (!%p283_p11), %s1064_s24, 2 }
  0x1d   : > { %1395 = sst [smem:[#allocation12_spill]] %s1216_s18  ;;  %p498_p2 = scmp.eq.s32.totalorder (!%p283_p11), %s1064_s24, 0 }
  0x1e   : > { %v1090_v0 = vmov 0   ;;  %s338_s7 = scalar_select %p337_p13, %s1072_s26, 1  ;;  %vm409_vm0 = vcmask 1043456   ;;  %vm396_vm1 = vcmask 31744  }
  0x1f   : > { %978 = vset.pattern.permute.xlu0 %v1090_v0  ;;  %979 = vset.pattern.permute.xlu1 %v1090_v0  ;;  %s340_s8 = scalar_select %p339_p0, %s1068_s25, 1 }
  0x20   : > { %s829_s14 = sshll.u32 %s338_s7, 1  ;;  %s837_s15 = sshll.u32 %s338_s7, 3 }
  0x21   : > { %s342_s16 = sadd.s32 %s829_s14, %s340_s8  ;;  %s1396_s6 = sld [smem:[#allocation13_spill]] }
  0x22   : > { %s830_s9 = sshll.u32 %s342_s16, 2  ;;  %p843_p3 = scmp.ne.s32.totalorder %s1064_s24, 0 }
  0x23   : > { %s344_s28 = scalar_lea.vmem %s1371_s0, %s830_s9 }
  0x24   : > { %v371_v1 = vld [vmem:[%s344_s28] sm:$0xf]  ;;  %s346_s27 = scalar_select %p345_p1, %s1064_s24, 2 }
  0x25   : > { %865 = vmatprep.subr.msk.mxu0 %vm409_vm0, %v371_v1 }
  0x26   : > { %866 = vmatpush3.msk.msra.mxu0 %vm409_vm0, %v371_v1  ;;  %s853_s18 = sshll.u32 %s346_s27, 5  ;;  %s835_s23 = sshll.u32 %s346_s27, 3 }
  0x27   : > { %s1231_s10 = scalar_lea.vmem %s1396_s6, %s837_s15  ;;  %s349_s14 = scalar_lea.vmem %s1372_s1, %s853_s18 }
  0x28   : > { %s1243_s16 = scalar_lea.vmem %s1374_s3, %s835_s23  ;;  %s1248_s29 = scalar_lea.vmem %s1375_s4, %s835_s23  ;;  %v367_v2 = vld [vmem:[%s349_s14] sm:$0xff]  ;;  %v368_v3 = vld [vmem:[%s349_s14 + $0x8] sm:$0xff]  ;;  %v369_v4 = vld [vmem:[%s349_s14 + $0x10] sm:$0xff] }
  0x29   : > { %s354_s9 = scalar_lea.vmem %s1373_s2, %s853_s18  ;;  %867 = vmatprep.mubr.msk.f32.mxu0 %vm396_vm1, %v367_v2  ;;  %v370_v7 = vld [vmem:[%s349_s14 + $0x18] sm:$0xff]  ;;  %s1259_s6 = scalar_lea.vmem [#allocation2], %s1222_s20 }
  0x2a   : > { %v372_v5 = vld [vmem:[%s354_s9] sm:$0xff]  ;;  %v374_v6 = vld [vmem:[%s354_s9 + $0x10] sm:$0xff]  ;;  %868 = vmatmul.mubr.msk.f32.vlgmr.msra.gmra.mxu0 %vm396_vm1, %v368_v3  ;;  %v373_v8 = vld [vmem:[%s354_s9 + $0x8] sm:$0xff] }
  0x2b   : > { %378 = vperm.xlu0 %978, %v372_v5   ;;  %870 = vmatprep.mubr.msk.f32.mxu0 %vm396_vm1, %v369_v4  ;;  %v375_v9 = vld [vmem:[%s354_s9 + $0x18] sm:$0xff] }
  0x2c   : > { %388 = vperm.xlu1 %979, %v374_v6  }
  0x2e   : > { %871 = vmatmul.mubr.msk.f32.gmra.mxu0 %vm396_vm1, %v370_v7 }
  0x2f   : > { %383 = vperm.xlu0 %978, %v373_v8  }
  0x30   : > { %393 = vperm.xlu1 %979, %v375_v9  }
  0xa6   : > { %v379_v10 = vpop.permute.xlu0 %378 }
  0xa7   : > { %v389_v11 = vpop.permute.xlu1 %388 }
  0xaa   : > { %v384_v12 = vpop.permute.xlu0 %383 }
  0xab   : > { %v394_v17 = vpop.permute.xlu1 %393 }
  0xea   : > { %v869_v13 = vpop.f32.mrf.mxu0 }
  0xeb   : > { %v485_v14 = vadd.f32 %v869_v13, %v384_v12 }
  0xec   : > { %v479_v15 = vpop.f32.mrf.mxu0 }
  0xed   : > { %v480_v16 = vadd.f32 %v479_v15, %v379_v10  ;;  %501 = sbr.rel (%p843_p3) target bundleno = 244 (0xf4), region = 44 }
  0xee   : > { %v872_v18 = vpop.f32.mrf.mxu0 }
  0xef   : > { %v495_v19 = vadd.f32 %v872_v18, %v394_v17 }
  0xf0   : > { %v489_v20 = vpop.f32.mrf.mxu0 }
  0xf1   : > { %v490_v21 = vadd.f32 %v489_v20, %v389_v11 }
  0xf2   : > { %502 = vst [vmem:[%s1259_s6] sm:$0xff] %v480_v16  ;;  %503 = vst [vmem:[%s1259_s6 + $0x8] sm:$0xff] %v485_v14 }
  0xf3   : > { %504 = vst [vmem:[%s1259_s6 + $0x10] sm:$0xff] %v490_v21  ;;  %505 = vst [vmem:[%s1259_s6 + $0x18] sm:$0xff] %v495_v19 }
  0xf4 PF: > { %509 = sbr.rel (%p498_p2) target bundleno = 255 (0xff), region = 48 }
  0xfa   : > { %v512_v24 = vld [vmem:[%s1259_s6 + $0x10] sm:$0xff]  ;;  %v513_v28 = vld [vmem:[%s1259_s6 + $0x18] sm:$0xff] }
  0xfb   : > { %v510_v22 = vld [vmem:[%s1259_s6] sm:$0xff]  ;;  %v511_v23 = vld [vmem:[%s1259_s6 + $0x8] sm:$0xff]  ;;  %v516_v27 = vadd.f32 %v512_v24, %v490_v21  ;;  %v517_v29 = vadd.f32 %v513_v28, %v495_v19 }
  0xfc   : > { %v514_v25 = vadd.f32 %v510_v22, %v480_v16  ;;  %v515_v26 = vadd.f32 %v511_v23, %v485_v14 }
  0xfd   : > { %520 = vst [vmem:[%s1259_s6 + $0x10] sm:$0xff] %v516_v27  ;;  %521 = vst [vmem:[%s1259_s6 + $0x18] sm:$0xff] %v517_v29 }
  0xfe   : > { %518 = vst [vmem:[%s1259_s6] sm:$0xff] %v514_v25  ;;  %519 = vst [vmem:[%s1259_s6 + $0x8] sm:$0xff] %v515_v26 }
  0xff PF: > { %p522_p4 = scmp.eq.s32.totalorder %s1064_s24, 2  ;;  %p845_p5 = scmp.ne.s32.totalorder %s1064_s24, 2 }
 0x101   : > { %525 = sbr.rel (%p845_p5) target bundleno = 268 (0x10c), region = 52 }
 0x106   : > { %v526_v30 = vld [vmem:[%s1259_s6] sm:$0xff]  ;;  %v527_v31 = vld [vmem:[%s1259_s6 + $0x8] sm:$0xff]  ;;  %v528_v32 = vld [vmem:[%s1259_s6 + $0x10] sm:$0xff] }
 0x107   : > { %v530_v33 = vmul.f32 0.33333334, %v526_v30  ;;  %v531_v34 = vmul.f32 0.33333334, %v527_v31  ;;  %v532_v35 = vmul.f32 0.33333334, %v528_v32 }
 0x108   : > { %v529_v36 = vld [vmem:[%s1259_s6 + $0x18] sm:$0xff] }
 0x109   : > { %534 = vst [vmem:[%s1259_s6] sm:$0xff] %v530_v33  ;;  %535 = vst [vmem:[%s1259_s6 + $0x8] sm:$0xff] %v531_v34  ;;  %v533_v37 = vmul.f32 0.33333334, %v529_v36 }
 0x10a   : > { %536 = vst [vmem:[%s1259_s6 + $0x10] sm:$0xff] %v532_v35 }
 0x10b   : > { %537 = vst [vmem:[%s1259_s6 + $0x18] sm:$0xff] %v533_v37 }
 0x10c PF: > { %v1091_v38 = vmov 0.0   ;;  %vm1092_vm2 = vmmov 0   ;;  %v538_v39 = vld [vmem:[%s1243_s16] sm:$0xff]  ;;  %vm539_vm3 = vcmask 261120   ;;  %p616_p8 = scmp.eq.s32.totalorder %s1068_s25, 0 }
 0x10d   : > { %873 = vmatprep.subr.mxu1 %v1091_v38  ;;  %881 = vmatprep.mubr.msk.f32.mxu1 %vm1092_vm2, %v1091_v38 }
 0x10e   : > { %874 = vmatpush3.msra.mxu1 %v495_v19  ;;  %p617_p9 = pnand %p616_p8, %p498_p2 }
 0x10f   : > { %875 = vmatprep.subr.mxu1 %v1091_v38 }
 0x110   : > { %876 = vmatpush3.msra.mxu1 %v490_v21 }
 0x111   : > { %877 = vmatprep.subr.mxu1 %v1091_v38 }
 0x112   : > { %878 = vmatpush3.msra.mxu1 %v485_v14 }
 0x113   : > { %879 = vmatprep.subr.mxu1 %v1091_v38 }
 0x114   : > { %880 = vmatpush3.msra.mxu1 %v480_v16 }
 0x115   : > { %882 = vmatmul.mubr.msk.f32.vlgmr.msra.gmra.mxu1 %vm539_vm3, %v538_v39 }
 0x1d5   : > { %v609_v40 = vpop.f32.mrf.mxu1 }
 0x1d6   : > { %613 = vadd.xlane.f32.xlu0 %v609_v40 }
 0x1d7   : > { %v883_v41 = vpop.f32.mrf.mxu1 }
 0x25c   : > { %620 = sbr.rel (%p617_p9) target bundleno = 611 (0x263), region = 56 }
 0x25f   : > { %v614_v42 = vpop.xlane.xlu0 %613 }
 0x260   : > { %v615_v43 = vmul.f32 0.00390625, %v614_v42 }
 0x261   : > { %vm621_vm4 = vcmask 7168   ;;  %v1093_v44 = vmov 0.0  }
 0x262   : > { %622 = vst.msk [vmem:[%s1231_s10] sm:$0xff] %vm621_vm4, %v1093_v44 }
 0x263 PF: > { %vm625_vm5 = vcmask 7168   ;;  %p847_p10 = scmp.ne.s32.totalorder %s1068_s25, 0 }
 0x268   : > { %629 = sbr.rel (%p847_p10) target bundleno = 631 (0x277), region = 60 }
 0x269   : > { %v623_v45 = vld [vmem:[%s1231_s10] sm:$0xff] }
 0x26a   : > { %v624_v46 = vadd.f32 %v623_v45, %v615_v43 }
 0x26c   : > { %626 = vst.msk [vmem:[%s1231_s10] sm:$0xff] %vm625_vm5, %v624_v46 }
 0x26d   : > { %v631_v48 = vld [vmem:[%s1248_s29] sm:$0xff] }
 0x273   : > { %v630_v47 = vld [vmem:[%s1231_s10] sm:$0xff] }
 0x274   : > { %v632_v49 = vadd.f32 %v631_v48, %v630_v47 }
 0x276   : > { %633 = vst.msk [vmem:[%s1231_s10] sm:$0xff] %vm625_vm5, %v632_v49 }
 0x277 PF: > { %p634_p11 = scmp.eq.s32.totalorder %s1068_s25, 1 }
 0x279   : > { %p635_p12 = pnand %p634_p11, %p522_p4 }
 0x27b   : > { %638 = sbr.rel (%p635_p12) target bundleno = 644 (0x284), region = 64 }
 0x280   : > { %v639_v50 = vld [vmem:[%s1231_s10] sm:$0xff] }
 0x281   : > { %v640_v51 = vmul.f32 0.33333334, %v639_v50 }
 0x283   : > { %641 = vst.msk [vmem:[%s1231_s10] sm:$0xff] %vm625_vm5, %v640_v51 }
 0x284 PF: > { %s849_s23 = sshll.u32 %s1072_s26, 3  ;;  %s661_s19 = sshll.u32 %s1259_s6, 4  ;;  %s1305_s19 = int_to_ptr.vmem [resolvable:$true] %s661_s19 }
 0x285   : > { %s658_s18 = sadd.s32 %s1068_s25, %s849_s23  ;;  %s1397_s10 = sand.u32 1, %s1056_s22  }
 0x286   : > { %s850_s20 = sshll.u32 %s658_s18, 7  ;;  %s1314_s14 = scalar_lea.sflag [#allocation3], %s1397_s10 }
 0x287   : > { %s1310_s8 = scalar_lea.hbm %s1376_s5, %s850_s20  ;;  %s980_s11 = scalar_lea.vmem %s1305_s19, 512 }
 0x288   : > { %p981_p13 = scmp.ne.s32.totalorder %s1305_s19, %s980_s11  ;;  %s1094_s25 = smov [#allocation2]  }
 0x289   : > { %s984_s26 = sshll.u32 %s1094_s25, 4  ;;  %s985_s26 = int_to_ptr.vmem [resolvable:$false] %s984_s26 }
 0x28a   : > { %p982_p0 = pnand %p981_p13, %p1195_p6  ;;  %s986_s15 = scalar_lea.vmem %s985_s26, 1024 }
 0x28b   : > { %p987_p2 = scmp.lt.s32.totalorder %s1305_s19, %s985_s26  ;;  %p988_p3 = scmp.lt.s32.totalorder %s986_s15, %s980_s11 }
 0x28c   : > { %p983_p1 = pneg %p982_p0 }
 0x28d   : > { %p989_p4 = por %p988_p3, %p987_p2 }
 0x28f   : > { %p990_p5 = pnand %p989_p4, %p983_p1 }
 0x291   : > { %993 = shalt.err (!%p990_p5)
}
 0x292   : > { %s994_s16 = scalar_lea.hbm %s1310_s8, 512  ;;  %s998_s27 = scalar_lea.hbm %s1376_s5, 2048 }
 0x293   : > { %p995_p8 = scmp.ne.s32.totalorder %s1310_s8, %s994_s16  ;;  %p999_p11 = scmp.lt.s32.totalorder %s1310_s8, %s1376_s5 }
 0x294   : > { %p1000_p12 = scmp.lt.s32.totalorder %s998_s27, %s994_s16 }
 0x295   : > { %p996_p9 = pnand %p995_p8, %p1195_p6 }
 0x296   : > { %p1001_p13 = por %p1000_p12, %p999_p11 }
 0x297   : > { %p997_p10 = pneg %p996_p9 }
 0x299   : > { %p1002_p0 = pnand %p1001_p13, %p997_p10 }
 0x29b   : > { %1005 = shalt.err (!%p1002_p0)
}
 0x29c   : > { %s1095_s6 = smov 128   ;;  %s1096_s23 = smov 256  }
 0x29d   : > { %s1097_s18 = smov 8  }
 0x29e   : > { %884 = dma.vmem_to_hbm [thread:$0]  (%p1195_p6), %s1305_s19, 512, %s1310_s8, %s1314_s14, %s1095_s6, %s1096_s23, %s1097_s18  }
 0x29f PF: > { %p890_p1 = scmp.ge.s32.totalorder %s1088_s30, 2  ;;  %s679_s20 = sand.u32 1, %s1052_s21  }
 0x2a0   : > { %s680_s24 = scalar_lea.sflag [#allocation3], %s679_s20 }
 0x2a1   : > { %p887_p2 = pnand %p890_p1, %p1202_p7 }
 0x2a3   : > { %p888_p3 = pneg %p887_p2 }
 0x2a5   : > { %1047 = dma.done.wait (%p888_p3), %s680_s24, 512  }
 0x2a6   : > { %1049 = vsyncadd (%p888_p3), %s680_s24, 4294966784  ;;  %s20_s30 = sadd.s32 1, %s1088_s30   ;;  %s1398_s7 = sld [smem:[#allocation5_spill]] }
 0x2a7   : > { %p17_p4 = scmp.ge.s32.totalorder %s20_s30, 14   ;;  %s1399_s23 = sld [smem:[#allocation12_spill]] }
 0x2a8   : > { %s1400_s24 = sld [smem:[#allocation6_spill]]  ;;  %s1406_s21 = smov %s1056_s22 }
 0x2a9   : > { %s1401_s25 = sld [smem:[#allocation7_spill]]  ;;  %19 = sbr.rel (!%p17_p4) target bundleno = 8 (0x8), region = 123 }
 0x2aa   : > { %s1402_s26 = sld [smem:[#allocation8_spill]] }
 0x2ab   : > { %s1403_s27 = sld [smem:[#allocation9_spill]] }
 0x2ac   : > { %s1404_s28 = sld [smem:[#allocation10_spill]]  ;;  %s1407_s22 = smov %s1398_s7 }
 0x2ad   : > { %s1405_s29 = sld [smem:[#allocation11_spill]] }
 0x2ae   :  { %692 = vsyncpa [#allocation3], 1 }
 0x2af   :  { %694 = vsyncpa [#allocation3 + $0x1], 1 }

</bundles_post_ra>
